<compile_context>
chip_gen: v5e
topology: v5e:2x2
jax: 0.10.0
libtpu: 0.0.40
codegen_flags: <defaults>
</compile_context>

<pallas_src>
import functools

import jax
import jax.numpy as jnp
from jax.experimental import pallas as pl
from jax.experimental.pallas import tpu as pltpu


def _round_up(x: int, m: int) -> int:
    return ((x + m - 1) // m) * m


def _slab_budget_bytes() -> int:
    """Per-input-stream slab budget (f32 bytes), generation aware."""
    try:
        vmem = pltpu.get_tpu_info().vmem_capacity_bytes
    except Exception:  # interpret mode / older jax: assume the small-VMEM part
        vmem = 64 << 20
    # 1-4 MiB slabs already sit near the HBM roofline; the 128 MiB-VMEM parts
    # (v5e/v6e) can afford larger slabs -> fewer ~0.35us grid steps.  Keep v7x
    # (64 MiB physical) well under budget: 3 streams x 2 pipeline buffers.
    return (6 << 20) if vmem >= (96 << 20) else (3 << 20)


def _pick_images_per_step(nc: int, img_bytes: int, budget_bytes: int) -> int:
    """Images per grid step: fits the slab budget, leaves >=2 (ideally >=8)
    balanced grid steps for the v7x megacore / DMA pipeline, and prefers a
    multiple of 8 for full sublane utilization."""
    t_cap = max(1, budget_bytes // img_bytes)
    total_bytes = nc * img_bytes
    target_steps = 8 if total_bytes >= (8 << 20) else 2
    t = max(1, min(t_cap, pl.cdiv(nc, target_steps)))
    if t >= 8:
        t = (t // 8) * 8
        steps = pl.cdiv(nc, t)
        # Rebalance so zero-padding stays small (still <= budget, still %8==0).
        t = min(t, _round_up(pl.cdiv(nc, steps), 8))
    return t


def _atten_flat_kernel(gt_ref, pred_ref, mask_ref, out_ref, *, w: int):
    """Block = (1, t, h*w): t whole images, each flattened on the lane axis."""
    gt = gt_ref[...].astype(jnp.float32)
    pr = pred_ref[...].astype(jnp.float32)
    mk = mask_ref[...].astype(jnp.float32)

    diff = gt - pr
    md = diff * mk  # gtdx - preddx == d(md)/dx (shared mask); same for dy

    hw = md.shape[-1]
    col = jax.lax.broadcasted_iota(jnp.int32, md.shape, md.ndim - 1)

    # dx: md[k+1] - md[k]; last column of every row (incl. wrap term) -> 0.
    nxt = pltpu.roll(md, hw - 1, axis=md.ndim - 1)      # == jnp.roll(md, -1, -1)
    dx = jnp.where(col % w == w - 1, 0.0, nxt - md)

    # dy: md[k+w] - md[k]; last row of every image (incl. wrap terms) -> 0.
    nxt_row = pltpu.roll(md, hw - w, axis=md.ndim - 1)  # == jnp.roll(md, -w, -1)
    dy = jnp.where(col >= hw - w, 0.0, nxt_row - md)

    sq = jnp.sum(diff * diff)
    sdx = jnp.sum(jnp.abs(dx))
    sdy = jnp.sum(jnp.abs(dy))

    lane = jax.lax.broadcasted_iota(jnp.int32, (1, 1, 3), 2)
    out_ref[...] = jnp.where(lane == 0, sq, jnp.where(lane == 1, sdx, sdy))


def _atten_image_kernel(gt_ref, pred_ref, mask_ref, out_ref):
    """Block = (t, h, w): whole images, used when images are too big to pack
    (then w >= 128 in practice, so the (h, w) layout is already lane dense)."""
    gt = gt_ref[...].astype(jnp.float32)
    pr = pred_ref[...].astype(jnp.float32)
    mk = mask_ref[...].astype(jnp.float32)

    diff = gt - pr
    md = diff * mk

    sq = jnp.sum(diff * diff)
    sdx = jnp.sum(jnp.abs(md[:, :, 1:] - md[:, :, :-1]))
    sdy = jnp.sum(jnp.abs(md[:, 1:, :] - md[:, :-1, :]))

    lane = jax.lax.broadcasted_iota(jnp.int32, (1, 1, 3), 2)
    out_ref[...] = jnp.where(lane == 0, sq, jnp.where(lane == 1, sdx, sdy))


def _pad_images(x2d, rows):
    if x2d.shape[0] == rows:
        return x2d
    return jnp.pad(x2d, ((0, rows - x2d.shape[0]), (0, 0)))


def atten_loss(ground_truth, predict, mask, *, slab_budget_bytes=None):
    """AttenLoss.forward for 4-D NCHW tensors as one fused pallas_call."""
    # TODO(synk): the 3-D [h, w, c] branch of get_image_gradients (and its
    # host-side rank ValueError) is not implemented; only the 4-D path is.
    n, c, h, w = ground_truth.shape
    nc, hw = n * c, h * w
    numel = n * c * h * w

    if mask.shape != ground_truth.shape:
        # TODO(synk): a [N,1,H,W]-style mask could keep its own BlockSpec
        # instead of being materialized; the broadcast stays in the mask's
        # native (often narrow) dtype so the extra HBM traffic is small.
        mask = jnp.broadcast_to(mask, ground_truth.shape)

    budget = _slab_budget_bytes() if slab_budget_bytes is None else int(slab_budget_bytes)
    img_bytes = hw * 4                     # budgeted in f32 terms (upper bound)
    flat = budget >= 8 * img_bytes         # >= 8 images/slab -> lane-dense packing

    t = _pick_images_per_step(nc, img_bytes, budget)
    steps = pl.cdiv(nc, t)
    nc_pad = steps * t                     # zero images contribute 0 to all sums

    # Native dtypes straight into the kernel; f32 cast happens on the VPU inside.
    gt = _pad_images(ground_truth.reshape(nc, hw), nc_pad)
    pr = _pad_images(predict.reshape(nc, hw), nc_pad)
    mk = _pad_images(mask.reshape(nc, hw), nc_pad)

    if flat:
        shape3, block = (steps, t, hw), (1, t, hw)
        kernel = functools.partial(_atten_flat_kernel, w=w)
        vmem_block = _round_up(t, 8) * hw * 4
    else:
        # TODO(synk): single images larger than the slab budget (e.g. 4K f32 on
        # v7x) would need H-slab tiling with a one-row halo; not implemented.
        shape3, block = (nc_pad, h, w), (t, h, w)
        kernel = _atten_image_kernel
        vmem_block = t * _round_up(h, 8) * _round_up(w, 128) * 4

    gt, pr, mk = (x.reshape(shape3) for x in (gt, pr, mk))

    in_spec = pl.BlockSpec(block, lambda i: (i, 0, 0))
    out_spec = pl.BlockSpec((1, 1, 3), lambda i: (i, 0, 0))
    # 3 input streams x 2 pipeline buffers + headroom for f32 temporaries.
    vmem_limit = int(min(max(8 << 20, 8 * vmem_block + (2 << 20)), 100 << 20))

    partials = pl.pallas_call(
        kernel,
        grid=(steps,),
        in_specs=[in_spec, in_spec, in_spec],
        out_specs=out_spec,
        out_shape=jax.ShapeDtypeStruct((steps, 1, 3), jnp.float32),
        compiler_params=pltpu.CompilerParams(
            dimension_semantics=("parallel",),
            vmem_limit_bytes=vmem_limit,
        ),
    )(gt, pr, mk)

    sums = jnp.sum(partials.reshape(steps, 3), axis=0)
    inv = 1.0 / float(numel)
    mse = sums[0] * inv
    # F.l1_loss averages over the FULL tensor (zero last row/col included).
    grad_loss = (sums[1] + sums[2]) * (0.5 * inv)
    return mse + grad_loss


# ---------------------------------------------------------------------------
# Pure-JAX reference that mirrors the PyTorch code exactly (sanity check).
# ---------------------------------------------------------------------------
def _image_gradients_ref(image):
    right = jnp.pad(image, ((0, 0), (0, 0), (0, 0), (0, 1)))[..., :, 1:]
    bottom = jnp.pad(image, ((0, 0), (0, 0), (0, 1), (0, 0)))[..., 1:, :]
    dx = right - image
    dy = bottom - image
    dx = dx.at[:, :, :, -1].set(0.0)
    dy = dy.at[:, :, -1, :].set(0.0)
    return dy, dx


def atten_loss_ref(ground_truth, predict, mask):
    mse = jnp.mean((ground_truth - predict) ** 2)
    gtdy, gtdx = _image_gradients_ref(ground_truth * mask)
    pdy, pdx = _image_gradients_ref(predict * mask)
    grad = (jnp.mean(jnp.abs(gtdx - pdx)) + jnp.mean(jnp.abs(gtdy - pdy))) / 2
    return mse + grad


if __name__ == "__main__":
    key = jax.random.PRNGKey(0)
    k1, k2, k3 = jax.random.split(key, 3)
    N, C, H, W = 2, 4, 16, 16
    gt = jax.random.normal(k1, (N, C, H, W), jnp.float32)
    pred = gt + 0.1 * jax.random.normal(k2, (N, C, H, W), jnp.float32)
    mask = (jax.random.uniform(k3, (N, C, H, W)) > 0.5).astype(jnp.float32)

    # Main (flat / lane-dense, roll-based) path.
    loss = jax.block_until_ready(jax.jit(atten_loss)(gt, pred, mask))
    ref = jax.block_until_ready(atten_loss_ref(gt, pred, mask))
    assert jnp.isfinite(loss), loss
    assert jnp.allclose(loss, ref, rtol=1e-5, atol=1e-5), (loss, ref)

    # Whole-image fallback path + broadcast mask, forced via a tiny slab budget.
    mask_b = (jax.random.uniform(k3, (N, 1, H, W)) > 0.5).astype(jnp.float32)
    fn = functools.partial(atten_loss, slab_budget_bytes=4 * H * W * 4)
    loss2 = jax.block_until_ready(jax.jit(fn)(gt, pred, mask_b))
    ref2 = jax.block_until_ready(atten_loss_ref(gt, pred, mask_b))
    assert jnp.allclose(loss2, ref2, rtol=1e-5, atol=1e-5), (loss2, ref2)

    print("KERNEL_OK")
</pallas_src>

<mosaic_0001>
module attributes {stable_mosaic.version = 11 : i64} {
  func.func @_atten_flat_kernel(%arg0: i32, %arg1: memref<1x4x256xf32, #tpu.memory_space<vmem>>, %arg2: memref<1x4x256xf32, #tpu.memory_space<vmem>>, %arg3: memref<1x4x256xf32, #tpu.memory_space<vmem>>, %arg4: memref<1x1x3xf32, #tpu.memory_space<vmem>>) attributes {dimension_semantics = [#tpu.dimension_semantics<parallel>], iteration_bounds = array<i64: 2>, scalar_prefetch = 0 : i64, scratch_operands = 0 : i64, tpu.core_type = #tpu.core_type<tc>, window_params = [{transform_indices = @transform_0, window_bounds = array<i64: 1, 4, 256>}, {transform_indices = @transform_1, window_bounds = array<i64: 1, 4, 256>}, {transform_indices = @transform_2, window_bounds = array<i64: 1, 4, 256>}, {transform_indices = @transform_3, window_bounds = array<i64: 1, 1, 3>}]} {
    %c0 = arith.constant 0 : index
    %c0_0 = arith.constant 0 : index
    %c0_1 = arith.constant 0 : index
    %0 = vector.load %arg1[%c0, %c0_0, %c0_1] : memref<1x4x256xf32, #tpu.memory_space<vmem>>, vector<1x4x256xf32>
    %c0_2 = arith.constant 0 : index
    %c0_3 = arith.constant 0 : index
    %c0_4 = arith.constant 0 : index
    %1 = vector.load %arg2[%c0_2, %c0_3, %c0_4] : memref<1x4x256xf32, #tpu.memory_space<vmem>>, vector<1x4x256xf32>
    %c0_5 = arith.constant 0 : index
    %c0_6 = arith.constant 0 : index
    %c0_7 = arith.constant 0 : index
    %2 = vector.load %arg3[%c0_5, %c0_6, %c0_7] : memref<1x4x256xf32, #tpu.memory_space<vmem>>, vector<1x4x256xf32>
    %3 = arith.subf %0, %1 : vector<1x4x256xf32>
    %4 = arith.mulf %3, %2 : vector<1x4x256xf32>
    %5 = tpu.iota {dimensions = array<i32: 2>} : vector<1x4x256xi32>
    %c255_i32 = arith.constant 255 : i32
    %6 = tpu.dynamic_rotate %4 by %c255_i32 dim 2 : vector<1x4x256xf32>, i32 -> vector<1x4x256xf32>
    %c16_i32 = arith.constant 16 : i32
    %c0_i32 = arith.constant 0 : i32
    %7 = arith.cmpi eq, %c16_i32, %c0_i32 : i32
    %c1_i32 = arith.constant 1 : i32
    %8 = arith.select %7, %c1_i32, %c16_i32 : i32
    %9 = vector.broadcast %8 : i32 to vector<1x4x256xi32>
    %10 = arith.remsi %5, %9 : vector<1x4x256xi32>
    %c0_i32_8 = arith.constant 0 : i32
    %11 = vector.broadcast %c0_i32_8 : i32 to vector<1x4x256xi32>
    %12 = arith.cmpi ne, %10, %11 : vector<1x4x256xi32>
    %c0_i32_9 = arith.constant 0 : i32
    %13 = vector.broadcast %c0_i32_9 : i32 to vector<1x4x256xi32>
    %14 = arith.cmpi slt, %10, %13 : vector<1x4x256xi32>
    %c0_i32_10 = arith.constant 0 : i32
    %15 = arith.cmpi slt, %8, %c0_i32_10 : i32
    %16 = vector.broadcast %15 : i1 to vector<1x4x256xi1>
    %17 = vector.broadcast %16 : vector<1x4x256xi1> to vector<1x4x256xi1>
    %18 = arith.xori %14, %17 : vector<1x4x256xi1>
    %19 = arith.andi %18, %12 : vector<1x4x256xi1>
    %20 = vector.broadcast %8 : i32 to vector<1x4x256xi32>
    %21 = arith.addi %10, %20 : vector<1x4x256xi32>
    %22 = arith.select %19, %21, %10 : vector<1x4x256xi1>, vector<1x4x256xi32>
    %c15_i32 = arith.constant 15 : i32
    %23 = vector.broadcast %c15_i32 : i32 to vector<1x4x256xi32>
    %24 = arith.cmpi eq, %22, %23 : vector<1x4x256xi32>
    %25 = arith.subf %6, %4 : vector<1x4x256xf32>
    %cst = arith.constant 0.000000e+00 : f32
    %26 = vector.broadcast %cst : f32 to vector<1x4x256xf32>
    %27 = arith.select %24, %26, %25 : vector<1x4x256xi1>, vector<1x4x256xf32>
    %c240_i32 = arith.constant 240 : i32
    %28 = tpu.dynamic_rotate %4 by %c240_i32 dim 2 : vector<1x4x256xf32>, i32 -> vector<1x4x256xf32>
    %c240_i32_11 = arith.constant 240 : i32
    %29 = vector.broadcast %c240_i32_11 : i32 to vector<1x4x256xi32>
    %30 = arith.cmpi sge, %5, %29 : vector<1x4x256xi32>
    %31 = arith.subf %28, %4 : vector<1x4x256xf32>
    %cst_12 = arith.constant 0.000000e+00 : f32
    %32 = vector.broadcast %cst_12 : f32 to vector<1x4x256xf32>
    %33 = arith.select %30, %32, %31 : vector<1x4x256xi1>, vector<1x4x256xf32>
    %34 = arith.mulf %3, %3 : vector<1x4x256xf32>
    %35 = vector.shape_cast %34 : vector<1x4x256xf32> to vector<1x1x4x256xf32>
    %cst_13 = arith.constant dense<0.000000e+00> : vector<1xf32>
    %36 = vector.multi_reduction <add>, %35, %cst_13 [1, 2, 3] : vector<1x1x4x256xf32> to vector<1xf32>
    %37 = vector.shape_cast %36 : vector<1xf32> to vector<1x1x1x1xf32>
    %38 = vector.extract %37[0, 0, 0, 0] : f32 from vector<1x1x1x1xf32>
    %39 = math.absf %27 : vector<1x4x256xf32>
    %40 = vector.shape_cast %39 : vector<1x4x256xf32> to vector<1x1x4x256xf32>
    %cst_14 = arith.constant dense<0.000000e+00> : vector<1xf32>
    %41 = vector.multi_reduction <add>, %40, %cst_14 [1, 2, 3] : vector<1x1x4x256xf32> to vector<1xf32>
    %42 = vector.shape_cast %41 : vector<1xf32> to vector<1x1x1x1xf32>
    %43 = vector.extract %42[0, 0, 0, 0] : f32 from vector<1x1x1x1xf32>
    %44 = math.absf %33 : vector<1x4x256xf32>
    %45 = vector.shape_cast %44 : vector<1x4x256xf32> to vector<1x1x4x256xf32>
    %cst_15 = arith.constant dense<0.000000e+00> : vector<1xf32>
    %46 = vector.multi_reduction <add>, %45, %cst_15 [1, 2, 3] : vector<1x1x4x256xf32> to vector<1xf32>
    %47 = vector.shape_cast %46 : vector<1xf32> to vector<1x1x1x1xf32>
    %48 = vector.extract %47[0, 0, 0, 0] : f32 from vector<1x1x1x1xf32>
    %49 = tpu.iota {dimensions = array<i32: 2>} : vector<1x1x3xi32>
    %c0_i32_16 = arith.constant 0 : i32
    %50 = vector.broadcast %c0_i32_16 : i32 to vector<1x1x3xi32>
    %51 = arith.cmpi eq, %49, %50 : vector<1x1x3xi32>
    %c1_i32_17 = arith.constant 1 : i32
    %52 = vector.broadcast %c1_i32_17 : i32 to vector<1x1x3xi32>
    %53 = arith.cmpi eq, %49, %52 : vector<1x1x3xi32>
    %54 = vector.broadcast %43 : f32 to vector<1x1x3xf32>
    %55 = vector.broadcast %48 : f32 to vector<1x1x3xf32>
    %56 = arith.select %53, %54, %55 : vector<1x1x3xi1>, vector<1x1x3xf32>
    %57 = vector.broadcast %38 : f32 to vector<1x1x3xf32>
    %58 = arith.select %51, %57, %56 : vector<1x1x3xi1>, vector<1x1x3xf32>
    %c0_18 = arith.constant 0 : index
    %c0_19 = arith.constant 0 : index
    %c0_20 = arith.constant 0 : index
    %59 = vector.load %arg4[%c0_18, %c0_19, %c0_20] : memref<1x1x3xf32, #tpu.memory_space<vmem>>, vector<1x1x3xf32>
    tpu.vector_store %arg4[%c0_18, %c0_19, %c0_20], %58 {strides = array<i32>} : memref<1x1x3xf32, #tpu.memory_space<vmem>>, vector<1x1x3xf32>,
    return
  }
  func.func @transform_0(%arg0: i32) -> (i32, i32, i32) {
    %c0_i32 = arith.constant 0 : i32
    %c0_i32_0 = arith.constant 0 : i32
    %c0_i32_1 = arith.constant 0 : i32
    return %arg0, %c0_i32, %c0_i32_0 : i32, i32, i32
  }
  func.func @transform_1(%arg0: i32) -> (i32, i32, i32) {
    %c0_i32 = arith.constant 0 : i32
    %c0_i32_0 = arith.constant 0 : i32
    %c0_i32_1 = arith.constant 0 : i32
    return %arg0, %c0_i32, %c0_i32_0 : i32, i32, i32
  }
  func.func @transform_2(%arg0: i32) -> (i32, i32, i32) {
    %c0_i32 = arith.constant 0 : i32
    %c0_i32_0 = arith.constant 0 : i32
    %c0_i32_1 = arith.constant 0 : i32
    return %arg0, %c0_i32, %c0_i32_0 : i32, i32, i32
  }
  func.func @transform_3(%arg0: i32) -> (i32, i32, i32) {
    %c0_i32 = arith.constant 0 : i32
    %c0_i32_0 = arith.constant 0 : i32
    %c0_i32_1 = arith.constant 0 : i32
    return %arg0, %c0_i32, %c0_i32_0 : i32, i32, i32
  }
}

</mosaic_0001>

<bundles_post_ra>
// kernel: atten_loss.1
= control target key start
LH: loop header
LB: loop body
LE: loop exit
PB: predicated region body
PF: predicated region fallthrough
CT: control target
= control target key end

     0   :  { %s476_s12 = smov 0   ;;  %s517_s0 = inlined_call_operand.vmem [shape: f32[2,4,256], index: 0, kind: input, shape index: {}]   ;;  %s518_s1 = inlined_call_operand.vmem [shape: f32[2,4,256], index: 1, kind: input, shape index: {}]   ;;  %s519_s2 = inlined_call_operand.vmem [shape: f32[2,4,256], index: 2, kind: input, shape index: {}]   ;;  %s520_s3 = inlined_call_operand.vmem [shape: f32[2,1,3], index: 3, kind: output, shape index: {}]  }
   0x1 LB: > { %s414_s13 = sadd.s32 4294967295, %s452_s12   ;;  %p418_p0 = scmp.ge.s32.totalorder %s452_s12, 1  ;;  %s452_s12 = sphi %s476_s12, %s13_s12  }
   0x2   : > { %p157_p1 = scmp.lt.s32.totalorder %s452_s12, 3 }
   0x4   : > { %p158_p2 = pnand %p418_p0, %p157_p1 }
   0x5   : > { %p189_p3 = scmp.lt.s32.totalorder (!%p158_p2), %s414_s13, 1  ;;  %s454_s24 = smov (!%p158_p2), 127  }
   0x6   : > { %161 = sbr.rel (%p158_p2) target bundleno = 358 (0x166), region = 32  ;;  %s455_s25 = smov (!%p158_p2), 112  }
   0xb   : > { %s522_s13 = smov (!%p189_p3, %s414_s13), 1  ;;  %vm293_vm0 = vcmask 1043456   ;;  %v212_v19 = vlaneseq  ;;  %vm341_vm8 = vcmask 16384  }
   0xc   : > { %s427_s14 = sshll.u32 %s522_s13, 3  ;;  %s206_s4 = scalar_lea.vmem %s520_s3, %s522_s13 }
   0xd   : > { %s193_s17 = scalar_lea.vmem %s517_s0, %s427_s14  ;;  %s198_s20 = scalar_lea.vmem %s518_s1, %s427_s14  ;;  %v498_v20 = vand.u32 127, %v212_v19 }
   0xe   : > { %s203_s23 = scalar_lea.vmem %s519_s2, %s427_s14  ;;  %v207_v0 = vld [vmem:[%s193_s17] sm:$0xff] }
   0xf   : > { %v208_v1 = vld [vmem:[%s198_s20] sm:$0xff]  ;;  %v214_v22 = vadd.s32 128, %v498_v20  ;;  %v232_v23 = vand.u32 15, %v498_v20  ;;  %vm225_vm1 = vcmp.lt.s32.totalorder %v498_v20, 127  ;;  %vm272_vm4 = vcmp.lt.s32.totalorder %v498_v20, 112 }
  0x10   : > { %v209_v2 = vld [vmem:[%s203_s23] sm:$0xff]  ;;  %v210_v3 = vsub.f32 %v207_v0, %v208_v1  ;;  %vm335_vm6 = vcmp.eq.s32.totalorder %v498_v20, 1  ;;  %vm334_vm7 = vcmp.eq.s32.totalorder %v498_v20, 0 }
  0x11   : > { %v239_v24 = vand.u32 15, %v214_v22  ;;  %vm252_vm2 = vcmp.eq.s32.totalorder %v232_v23, 15  ;;  %vm276_vm5 = vcmp.ge.s32.totalorder %v214_v22, 240 }
  0x12   : > { %v211_v4 = vmul.f32 %v210_v3, %v209_v2  ;;  %v286_v11 = vmul.f32 %v210_v3, %v210_v3 }
  0x13   : > { %vm253_vm3 = vcmp.eq.s32.totalorder %v239_v24, 15 }
  0x14   : > { %216 = vst [vmem:[#allocation1] ss:$2 sm:$0xff] %v211_v4 }
  0x1b   : > { %v217_v5 = vld.sshfl [vmem:[#allocation1] sm:$0xff pattern:$0x75316420]  ;;  %v218_v6 = vld.sshfl [vmem:[#allocation1 + $0x8] sm:$0xff pattern:$0x75316420] }
  0x1c   : > { %221 = vrot.lane.b32.xlu0 %v217_v5, %s454_s24  ;;  %254 = vst [vmem:[#allocation1] ss:$2 sm:$0xff] %v211_v4 }
  0x23   : > { %v255_v7 = vld.sshfl [vmem:[#allocation1] sm:$0xff pattern:$0x75316420]  ;;  %v256_v8 = vld.sshfl [vmem:[#allocation1 + $0x8] sm:$0xff pattern:$0x75316420] }
  0x24   : > { %223 = vrot.lane.b32.xlu0 %v218_v6, %s454_s24  ;;  %263 = vst [vmem:[#allocation1] ss:$2 sm:$0xff] %v211_v4 }
  0x2b   : > { %v264_v9 = vld.sshfl [vmem:[#allocation1] sm:$0xff pattern:$0x75316420]  ;;  %v265_v10 = vld.sshfl [vmem:[#allocation1 + $0x8] sm:$0xff pattern:$0x75316420] }
  0x2c   : > { %268 = vrot.lane.b32.xlu1 %v264_v9, %s455_s25  ;;  %277 = vst [vmem:[#allocation1] ss:$2 sm:$0xff] %v211_v4 }
  0x33   : > { %v278_v12 = vld.sshfl [vmem:[#allocation1] sm:$0xff pattern:$0x75316420]  ;;  %v279_v13 = vld.sshfl [vmem:[#allocation1 + $0x8] sm:$0xff pattern:$0x75316420] }
  0x34   : > { %270 = vrot.lane.b32.xlu1 %v265_v10, %s455_s25  ;;  %288 = vst [vmem:[#allocation1] ss:$2 sm:$0xff] %v286_v11 }
  0x3b   : > { %v289_v14 = vld.sshfl [vmem:[#allocation1] sm:$0xff pattern:$0x75316420]  ;;  %v290_v15 = vld.sshfl [vmem:[#allocation1 + $0x8] sm:$0xff pattern:$0x75316420] }
  0x3c   : > { %v294_v16 = vsel %vm293_vm0, %v289_v14, 0.0  ;;  %v295_v17 = vsel %vm293_vm0, %v290_v15, 0.0 }
  0x3d   : > { %v296_v18 = vadd.f32 %v295_v17, %v294_v16 }
  0x3f   : > { %297 = vadd.xlane.f32.xlu2 %v296_v18 }
  0x8e   : > { %v222_v21 = vpop.permute.xlu0 %221 }
  0x96   : > { %v224_v25 = vpop.permute.xlu0 %223 }
  0x97   : > { %v226_v26 = vsel %vm225_vm1, %v222_v21, %v224_v25  ;;  %v227_v27 = vsel %vm225_vm1, %v224_v25, %v222_v21 }
  0x98   : > { %v259_v28 = vsub.f32 %v226_v26, %v255_v7  ;;  %v260_v29 = vsub.f32 %v227_v27, %v256_v8 }
  0x9a   : > { %v261_v30 = vsel %vm252_vm2, 0.0, %v259_v28  ;;  %v262_v31 = vsel %vm253_vm3, 0.0, %v260_v29 }
  0x9b   : > { %v306_v32 = vand.u32 2147483647, %v261_v30  ;;  %v307_v33 = vand.u32 2147483647, %v262_v31 }
  0x9d   : > { %v308_v34 = vsel %vm293_vm0, %v306_v32, 0.0  ;;  %v309_v35 = vsel %vm293_vm0, %v307_v33, 0.0 }
  0x9e   : > { %v269_v36 = vpop.permute.xlu1 %268  ;;  %v310_v37 = vadd.f32 %v309_v35, %v308_v34 }
  0xa0   : > { %311 = vadd.xlane.f32.xlu2 %v310_v37 }
  0xa6   : > { %v271_v38 = vpop.permute.xlu1 %270 }
  0xa7   : > { %v273_v39 = vsel %vm272_vm4, %v269_v36, %v271_v38  ;;  %v274_v40 = vsel %vm272_vm4, %v271_v38, %v269_v36 }
  0xa8   : > { %v282_v41 = vsub.f32 %v273_v39, %v278_v12  ;;  %v283_v42 = vsub.f32 %v274_v40, %v279_v13 }
  0xaa   : > { %v320_v43 = vand.u32 2147483647, %v282_v41  ;;  %v285_v44 = vsel %vm276_vm5, 0.0, %v283_v42 }
  0xab   : > { %v321_v45 = vand.u32 2147483647, %v285_v44 }
  0xac   : > { %v322_v46 = vsel %vm293_vm0, %v320_v43, 0.0 }
  0xad   : > { %v323_v47 = vsel %vm293_vm0, %v321_v45, 0.0 }
  0xae   : > { %v324_v48 = vadd.f32 %v323_v47, %v322_v46 }
  0xb0   : > { %325 = vadd.xlane.f32.xlu0 %v324_v48 }
  0xb2   : > { %v298_v49 = vpop.xlane.xlu2 %297 }
  0xb3   : > { %v299_v50 = vrot.slane %v298_v49, 4 }
  0xb5   : > { %v300_v51 = vadd.f32 %v299_v50, %v298_v49 }
  0xb7   : > { %v301_v52 = vrot.slane %v300_v51, 2 }
  0xb9   : > { %v302_v53 = vadd.f32 %v301_v52, %v300_v51 }
  0xbb   : > { %v303_v54 = vrot.slane %v302_v53, 1 }
  0xbd   : > { %v304_v55 = vadd.f32 %v303_v54, %v302_v53 }
  0xbf   : > { %430 = vpush %v304_v55 }
  0xf0   : > { %s431_s26 = spop %430 }
  0xf1   : > { %v339_v8 = vstv %s431_s26 }
 0x113   : > { %v312_v56 = vpop.xlane.xlu2 %311 }
 0x114   : > { %v313_v57 = vrot.slane %v312_v56, 4 }
 0x116   : > { %v314_v58 = vadd.f32 %v313_v57, %v312_v56 }
 0x118   : > { %v315_v59 = vrot.slane %v314_v58, 2 }
 0x11a   : > { %v316_v60 = vadd.f32 %v315_v59, %v314_v58 }
 0x11c   : > { %v317_v61 = vrot.slane %v316_v60, 1 }
 0x11e   : > { %v318_v62 = vadd.f32 %v317_v61, %v316_v60 }
 0x120   : > { %432 = vpush %v318_v62 }
 0x123   : > { %v326_v63 = vpop.xlane.xlu0 %325 }
 0x124   : > { %v327_v0 = vrot.slane %v326_v63, 4 }
 0x126   : > { %v328_v1 = vadd.f32 %v327_v0, %v326_v63 }
 0x128   : > { %v329_v2 = vrot.slane %v328_v1, 2 }
 0x12a   : > { %v330_v3 = vadd.f32 %v329_v2, %v328_v1 }
 0x12c   : > { %v331_v4 = vrot.slane %v330_v3, 1 }
 0x12e   : > { %v332_v5 = vadd.f32 %v331_v4, %v330_v3 }
 0x130   : > { %434 = vpush %v332_v5 }
 0x151   : > { %s433_s27 = spop %432 }
 0x152   : > { %v336_v6 = vstv %s433_s27 }
 0x161   : > { %s435_s28 = spop %434 }
 0x162   : > { %v337_v7 = vstv %s435_s28 }
 0x163   : > { %v338_v9 = vsel %vm335_vm6, %v336_v6, %v337_v7 }
 0x164   : > { %v340_v10 = vsel %vm334_vm7, %v339_v8, %v338_v9 }
 0x165   : > { %342 = vst.msk [vmem:[%s206_s4] sm:$0x1] %vm341_vm8, %v340_v10 }
 0x166 PF: > { %s13_s12 = sadd.s32 1, %s452_s12  }
 0x167   : > { %p10_p4 = scmp.ge.s32.totalorder %s13_s12, 4  }
 0x169   :  { %12 = sbr.rel (!%p10_p4) target bundleno = 1 (0x1), region = 68 }

</bundles_post_ra>
